<compile_context>
chip_gen: v7x
topology: tpu7x:2x2x1
jax: 0.10.0
libtpu: 0.0.40
codegen_flags: <defaults>
</compile_context>

<pallas_src>
import functools
import math

import jax
import jax.numpy as jnp
from jax import lax
from jax.experimental import pallas as pl
from jax.experimental.pallas import tpu as pltpu


_LANES = 512                    # lane-dense column width of the 2-D slab (multiple of 128)
_ROW_ALIGN = 32                 # covers f32 (8,128), bf16 (16,128), int8 (32,128) tiling
_TARGET_BLOCK_BYTES = 2 << 20   # ~2 MiB weight block per grid step
_MAX_BLOCK_ROWS = 1024          # cap rows so per-block elementwise temporaries stay small


def _default_compute_dtype():
    """bf16 float math on chips with bf16 VPU/EUP (v6e, v7x); f32 elsewhere."""
    try:
        kind = jax.devices()[0].device_kind.lower()
    except Exception:  # pragma: no cover
        return jnp.float32
    if ("v6" in kind) or ("v7" in kind) or ("7x" in kind):
        return jnp.bfloat16
    return jnp.float32


def _hash_u32(x):
    """lowbias32 / splitmix-style finalizer on uint32 (wrap-around arithmetic)."""
    x = x ^ (x >> 16)
    x = x * jnp.uint32(0x7FEB352D)
    x = x ^ (x >> 15)
    x = x * jnp.uint32(0x846CA68B)
    x = x ^ (x >> 16)
    return x


def _gaussian_block(seed_u32, tile_rows, tile_cols, row_offset, compute_dtype):
    """Per-element N(0,1) noise via counter-based hash + two-output Box-Muller.

    One (u1, u2) pair is hashed per TWO output elements: element (row, c) with
    c < tile_cols//2 gets r*cos(theta) and element (row, c + tile_cols//2) gets
    r*sin(theta).  The pair index depends only on the flat index within the
    512-wide slab, so the realized noise is independent of block size / grid /
    megacore partitioning.
    """
    half = tile_cols // 2
    row = lax.broadcasted_iota(jnp.int32, (tile_rows, half), 0)
    col = lax.broadcasted_iota(jnp.int32, (tile_rows, half), 1)
    pair_idx = ((row_offset + row).astype(jnp.uint32) * jnp.uint32(half)
                + col.astype(jnp.uint32))

    state = pair_idx * jnp.uint32(2654435761) + seed_u32 * jnp.uint32(2246822519)
    bits1 = _hash_u32(state)
    bits2 = _hash_u32(state ^ jnp.uint32(0x9E3779B9))

    # 23-bit uniforms: u1 in (0, 1], u2 in [0, 1).
    two_pow_neg23 = jnp.float32(1.0 / 8388608.0)
    u1 = ((bits1 >> 9).astype(jnp.int32).astype(jnp.float32) + 1.0) * two_pow_neg23
    u2 = (bits2 >> 9).astype(jnp.int32).astype(jnp.float32) * two_pow_neg23

    u1 = u1.astype(compute_dtype)
    u2 = u2.astype(compute_dtype)
    r = jnp.sqrt(jnp.asarray(-2.0, compute_dtype) * jnp.log(u1))
    theta = jnp.asarray(2.0 * math.pi, compute_dtype) * u2
    # Lane-axis concat of the two half-width Gaussian planes (cheap: 256 = 2 vregs).
    return jnp.concatenate([r * jnp.cos(theta), r * jnp.sin(theta)], axis=1)


def _perturb_kernel(seed_ref, w_ref, o_ref, *, perturb_mean, perturb_std,
                    compute_dtype):
    """out = w + (mean + std * N(0,1))   -- no mask stream."""
    tr, tc = w_ref.shape
    z = _gaussian_block(seed_ref[0].astype(jnp.uint32), tr, tc,
                        pl.program_id(0) * tr, compute_dtype)
    pert = (jnp.asarray(perturb_mean, compute_dtype)
            + jnp.asarray(perturb_std, compute_dtype) * z)
    o_ref[...] = (w_ref[...].astype(jnp.float32)
                  + pert.astype(jnp.float32)).astype(o_ref.dtype)


def _perturb_masked_kernel(seed_ref, w_ref, m_ref, o_ref, *, perturb_mean,
                           perturb_std, compute_dtype):
    """out = w + mask * (mean + std * N(0,1))   -- mask streamed as int8."""
    tr, tc = w_ref.shape
    z = _gaussian_block(seed_ref[0].astype(jnp.uint32), tr, tc,
                        pl.program_id(0) * tr, compute_dtype)
    pert = (jnp.asarray(perturb_mean, compute_dtype)
            + jnp.asarray(perturb_std, compute_dtype) * z)
    pert = jnp.where(m_ref[...] != 0, pert, jnp.zeros_like(pert))
    o_ref[...] = (w_ref[...].astype(jnp.float32)
                  + pert.astype(jnp.float32)).astype(o_ref.dtype)


def perturb_weights(weights,
                    perturb_mask=None,
                    *,
                    perturb_mean: float,
                    perturb_variance: float,
                    is_perturb: bool = True,
                    seed: int = 0,
                    compute_dtype=None):
    """JAX/Pallas equivalent of Perturbation.forward."""
    if not is_perturb:
        return weights

    orig_shape = weights.shape
    orig_dtype = weights.dtype
    n = int(weights.size)
    if n == 0:
        return weights
    assert n < (1 << 32), "counter-based PRNG uses a uint32 flat index"

    if compute_dtype is None:
        compute_dtype = _default_compute_dtype()

    itemsize = jnp.dtype(orig_dtype).itemsize
    rows_needed = pl.cdiv(n, _LANES)

    # ---- pick the block row count ------------------------------------------
    if rows_needed >= 2 * _ROW_ALIGN:
        tr = (_TARGET_BLOCK_BYTES // (_LANES * itemsize)) // _ROW_ALIGN * _ROW_ALIGN
        tr = max(_ROW_ALIGN, min(_MAX_BLOCK_ROWS, tr))
        # Guarantee >= 2 grid blocks so both v7x TensorCores get a share.
        tr = min(tr, max(_ROW_ALIGN, (rows_needed // 2) // _ROW_ALIGN * _ROW_ALIGN))
    else:
        # Tiny tensor: one block whose shape equals the full array dims (always legal).
        tr = rows_needed
    grid = pl.cdiv(rows_needed, tr)

    # ---- lay the native-dtype weights out as a lane-dense 2-D slab ----------
    flat = weights.reshape(-1)
    needs_pad = (n % _LANES) != 0
    pad_amount = rows_needed * _LANES - n
    if needs_pad:
        # Slow path only for sizes not divisible by 512 (typically tiny tensors).
        flat = jnp.pad(flat, (0, pad_amount))
    w2d = flat.reshape(rows_needed, _LANES)
    seed_arr = jnp.asarray([seed], dtype=jnp.int32)

    common = dict(
        perturb_mean=float(perturb_mean),
        # torch.normal(mean, std_tensor): the module's `perturb_variance` is the std.
        perturb_std=float(perturb_variance),
        compute_dtype=compute_dtype,
    )
    blk = pl.BlockSpec((tr, _LANES), lambda i, seed_ref: (i, 0))

    if perturb_mask is None:
        kernel = functools.partial(_perturb_kernel, **common)
        in_specs = [blk]
        operands = (seed_arr, w2d)
        mask_bytes = 0
    else:
        m_flat = perturb_mask.reshape(-1).astype(jnp.int8)
        if needs_pad:
            m_flat = jnp.pad(m_flat, (0, pad_amount))
        m2d = m_flat.reshape(rows_needed, _LANES)
        kernel = functools.partial(_perturb_masked_kernel, **common)
        in_specs = [blk, pl.BlockSpec((tr, _LANES), lambda i, seed_ref: (i, 0))]
        operands = (seed_arr, w2d, m2d)
        mask_bytes = n

    cost = pl.CostEstimate(
        flops=22 * n,            # ~9 int hash ops + ~8 fp ops per element
        transcendentals=2 * n,   # log+sqrt+cos+sin per pair of elements
        bytes_accessed=2 * n * itemsize + mask_bytes,
    )

    out2d = pl.pallas_call(
        kernel,
        out_shape=jax.ShapeDtypeStruct((rows_needed, _LANES), orig_dtype),
        grid_spec=pltpu.PrefetchScalarGridSpec(
            num_scalar_prefetch=1,
            grid=(grid,),
            in_specs=in_specs,
            out_specs=pl.BlockSpec((tr, _LANES), lambda i, seed_ref: (i, 0)),
        ),
        compiler_params=pltpu.CompilerParams(
            # Blocks are fully independent (counter-based PRNG), so the grid can
            # be sharded across v7x's two TensorCores.
            dimension_semantics=("parallel",),
            vmem_limit_bytes=32 * 1024 * 1024,
        ),
        cost_estimate=cost,
    )(*operands)

    out_flat = out2d.reshape(-1)
    if needs_pad:
        out_flat = out_flat[:n]
    return out_flat.reshape(orig_shape)


if __name__ == "__main__":
    key = jax.random.PRNGKey(0)
    k_w, k_m, k_b, k_p, k_pm = jax.random.split(key, 5)

    perturb_mean = 0.0
    perturb_variance = 0.01   # used as the std by torch.normal(mean, std)

    # 1) Small conv-style weight tensor (OIHW) with a perturbation mask
    #    (padded slow path, masked kernel).
    weights = jax.random.normal(k_w, (4, 4, 3, 3), dtype=jnp.float32)
    mask = jax.random.bernoulli(k_m, p=0.5, shape=weights.shape)
    perturbed = jax.block_until_ready(perturb_weights(
        weights, mask,
        perturb_mean=perturb_mean, perturb_variance=perturb_variance,
        is_perturb=True, seed=1234))
    assert perturbed.shape == weights.shape and perturbed.dtype == weights.dtype
    diff = perturbed - weights
    # Where the mask is False, the weight must be untouched.
    assert bool(jnp.all(jnp.where(mask, True, diff == 0.0)))

    # 2) is_perturb=False path (identity).
    passthrough = jax.block_until_ready(perturb_weights(
        weights, mask,
        perturb_mean=perturb_mean, perturb_variance=perturb_variance,
        is_perturb=False))
    assert bool(jnp.all(passthrough == weights))

    # 3) Copy-free fast path (n % 512 == 0), unmasked; check noise statistics.
    big = jnp.zeros((64, 512), jnp.float32)
    noise = jax.block_until_ready(perturb_weights(
        big, None,
        perturb_mean=perturb_mean, perturb_variance=perturb_variance,
        is_perturb=True, seed=7))
    assert abs(float(jnp.mean(noise)) - perturb_mean) < 2e-3
    assert 0.008 < float(jnp.std(noise)) < 0.012

    # 4) Fast path with a partial trailing grid block (65 rows, tr=32) + mask.
    w_part = jax.random.normal(k_p, (65, 512), dtype=jnp.float32)
    m_part = jax.random.bernoulli(k_pm, p=0.5, shape=w_part.shape)
    p_part = jax.block_until_ready(perturb_weights(
        w_part, m_part,
        perturb_mean=perturb_mean, perturb_variance=perturb_variance,
        is_perturb=True, seed=3))
    d_part = p_part - w_part
    assert bool(jnp.all(jnp.where(m_part, True, d_part == 0.0)))
    assert bool(jnp.any(d_part != 0.0))
    assert bool(jnp.all(jnp.isfinite(p_part)))

    # 5) Native-dtype (bf16) path: HBM traffic stays in bf16 end to end.
    w_bf16 = jax.random.normal(k_b, (8, 32, 3, 3), dtype=jnp.bfloat16)
    p_bf16 = jax.block_until_ready(perturb_weights(
        w_bf16, None,
        perturb_mean=perturb_mean, perturb_variance=perturb_variance,
        is_perturb=True, seed=99))
    assert p_bf16.shape == w_bf16.shape and p_bf16.dtype == jnp.bfloat16

    print("KERNEL_OK")
</pallas_src>

<mosaic_0001>
module attributes {stable_mosaic.version = 11 : i64} {
  func.func @_perturb_masked_kernel(%arg0: i32, %arg1: memref<1xi32, #tpu.memory_space<smem>>, %arg2: memref<1x512xf32, #tpu.memory_space<vmem>>, %arg3: memref<1x512xi8, #tpu.memory_space<vmem>>, %arg4: memref<1x512xf32, #tpu.memory_space<vmem>>) attributes {dimension_semantics = [#tpu.dimension_semantics<parallel>], iteration_bounds = array<i64: 1>, scalar_prefetch = 1 : i64, scratch_operands = 0 : i64, tpu.core_type = #tpu.core_type<tc>, window_params = [{transform_indices = @transform_0, window_bounds = array<i64: 1, 512>}, {transform_indices = @transform_1, window_bounds = array<i64: 1, 512>}, {transform_indices = @transform_2, window_bounds = array<i64: 1, 512>}]} {
    %c0 = arith.constant 0 : index
    %0 = memref.load %arg1[%c0] : memref<1xi32, #tpu.memory_space<smem>>
    %c1_i32 = arith.constant 1 : i32
    %1 = arith.muli %arg0, %c1_i32 : i32
    %2 = tpu.iota {dimensions = array<i32: 0>} : vector<1x256xi32>
    %3 = tpu.iota {dimensions = array<i32: 1>} : vector<1x256xi32>
    %4 = vector.broadcast %1 : i32 to vector<1x256xi32>
    %5 = arith.addi %4, %2 : vector<1x256xi32>
    %c256_i32 = arith.constant 256 : i32
    %6 = vector.broadcast %c256_i32 : i32 to vector<1x256xi32>
    %7 = arith.muli %5, %6 : vector<1x256xi32>
    %8 = arith.addi %7, %3 : vector<1x256xi32>
    %c-1640531535_i32 = arith.constant -1640531535 : i32
    %9 = vector.broadcast %c-1640531535_i32 : i32 to vector<1x256xi32>
    %10 = arith.muli %8, %9 : vector<1x256xi32>
    %c-2048144777_i32 = arith.constant -2048144777 : i32
    %11 = arith.muli %0, %c-2048144777_i32 : i32
    %12 = vector.broadcast %11 : i32 to vector<1x256xi32>
    %13 = arith.addi %10, %12 : vector<1x256xi32>
    %c16_i32 = arith.constant 16 : i32
    %14 = vector.broadcast %c16_i32 : i32 to vector<1x256xi32>
    %15 = arith.shrui %13, %14 : vector<1x256xi32>
    %16 = arith.xori %13, %15 : vector<1x256xi32>
    %c2146121005_i32 = arith.constant 2146121005 : i32
    %17 = vector.broadcast %c2146121005_i32 : i32 to vector<1x256xi32>
    %18 = arith.muli %16, %17 : vector<1x256xi32>
    %c15_i32 = arith.constant 15 : i32
    %19 = vector.broadcast %c15_i32 : i32 to vector<1x256xi32>
    %20 = arith.shrui %18, %19 : vector<1x256xi32>
    %21 = arith.xori %18, %20 : vector<1x256xi32>
    %c-2073254261_i32 = arith.constant -2073254261 : i32
    %22 = vector.broadcast %c-2073254261_i32 : i32 to vector<1x256xi32>
    %23 = arith.muli %21, %22 : vector<1x256xi32>
    %c16_i32_0 = arith.constant 16 : i32
    %24 = vector.broadcast %c16_i32_0 : i32 to vector<1x256xi32>
    %25 = arith.shrui %23, %24 : vector<1x256xi32>
    %26 = arith.xori %23, %25 : vector<1x256xi32>
    %c-1640531527_i32 = arith.constant -1640531527 : i32
    %27 = vector.broadcast %c-1640531527_i32 : i32 to vector<1x256xi32>
    %28 = arith.xori %13, %27 : vector<1x256xi32>
    %c16_i32_1 = arith.constant 16 : i32
    %29 = vector.broadcast %c16_i32_1 : i32 to vector<1x256xi32>
    %30 = arith.shrui %28, %29 : vector<1x256xi32>
    %31 = arith.xori %28, %30 : vector<1x256xi32>
    %c2146121005_i32_2 = arith.constant 2146121005 : i32
    %32 = vector.broadcast %c2146121005_i32_2 : i32 to vector<1x256xi32>
    %33 = arith.muli %31, %32 : vector<1x256xi32>
    %c15_i32_3 = arith.constant 15 : i32
    %34 = vector.broadcast %c15_i32_3 : i32 to vector<1x256xi32>
    %35 = arith.shrui %33, %34 : vector<1x256xi32>
    %36 = arith.xori %33, %35 : vector<1x256xi32>
    %c-2073254261_i32_4 = arith.constant -2073254261 : i32
    %37 = vector.broadcast %c-2073254261_i32_4 : i32 to vector<1x256xi32>
    %38 = arith.muli %36, %37 : vector<1x256xi32>
    %c16_i32_5 = arith.constant 16 : i32
    %39 = vector.broadcast %c16_i32_5 : i32 to vector<1x256xi32>
    %40 = arith.shrui %38, %39 : vector<1x256xi32>
    %41 = arith.xori %38, %40 : vector<1x256xi32>
    %c9_i32 = arith.constant 9 : i32
    %42 = vector.broadcast %c9_i32 : i32 to vector<1x256xi32>
    %43 = arith.shrui %26, %42 : vector<1x256xi32>
    %44 = arith.sitofp %43 : vector<1x256xi32> to vector<1x256xf32>
    %cst = arith.constant 1.000000e+00 : f32
    %45 = vector.broadcast %cst : f32 to vector<1x256xf32>
    %46 = arith.addf %44, %45 : vector<1x256xf32>
    %cst_6 = arith.constant 1.1920929E-7 : f32
    %47 = vector.broadcast %cst_6 : f32 to vector<1x256xf32>
    %48 = arith.mulf %46, %47 : vector<1x256xf32>
    %c9_i32_7 = arith.constant 9 : i32
    %49 = vector.broadcast %c9_i32_7 : i32 to vector<1x256xi32>
    %50 = arith.shrui %41, %49 : vector<1x256xi32>
    %51 = arith.sitofp %50 : vector<1x256xi32> to vector<1x256xf32>
    %cst_8 = arith.constant 1.1920929E-7 : f32
    %52 = vector.broadcast %cst_8 : f32 to vector<1x256xf32>
    %53 = arith.mulf %51, %52 : vector<1x256xf32>
    %54 = math.log %48 : vector<1x256xf32>
    %cst_9 = arith.constant -2.000000e+00 : f32
    %55 = vector.broadcast %cst_9 : f32 to vector<1x256xf32>
    %56 = arith.mulf %55, %54 : vector<1x256xf32>
    %57 = math.sqrt %56 : vector<1x256xf32>
    %cst_10 = arith.constant 6.28318548 : f32
    %58 = vector.broadcast %cst_10 : f32 to vector<1x256xf32>
    %59 = arith.mulf %58, %53 : vector<1x256xf32>
    %60 = math.cos %59 : vector<1x256xf32>
    %61 = arith.mulf %57, %60 : vector<1x256xf32>
    %62 = math.sin %59 : vector<1x256xf32>
    %63 = arith.mulf %57, %62 : vector<1x256xf32>
    %64 = tpu.concatenate %61, %63 in 1 : vector<1x256xf32>, vector<1x256xf32> -> vector<1x512xf32>
    %cst_11 = arith.constant 0.00999999977 : f32
    %65 = vector.broadcast %cst_11 : f32 to vector<1x512xf32>
    %66 = arith.mulf %65, %64 : vector<1x512xf32>
    %cst_12 = arith.constant 0.000000e+00 : f32
    %67 = vector.broadcast %cst_12 : f32 to vector<1x512xf32>
    %68 = arith.addf %67, %66 : vector<1x512xf32>
    %c0_13 = arith.constant 0 : index
    %c0_14 = arith.constant 0 : index
    %69 = vector.load %arg3[%c0_13, %c0_14] : memref<1x512xi8, #tpu.memory_space<vmem>>, vector<1x512xi8>
    %c0_i8 = arith.constant 0 : i8
    %70 = vector.broadcast %c0_i8 : i8 to vector<1x512xi8>
    %71 = arith.cmpi ne, %69, %70 : vector<1x512xi8>
    %cst_15 = arith.constant 0.000000e+00 : f32
    %72 = vector.broadcast %cst_15 : f32 to vector<1x512xf32>
    %73 = arith.select %71, %68, %72 : vector<1x512xi1>, vector<1x512xf32>
    %c0_16 = arith.constant 0 : index
    %c0_17 = arith.constant 0 : index
    %74 = vector.load %arg2[%c0_16, %c0_17] : memref<1x512xf32, #tpu.memory_space<vmem>>, vector<1x512xf32>
    %75 = arith.addf %74, %73 : vector<1x512xf32>
    %c0_18 = arith.constant 0 : index
    %c0_19 = arith.constant 0 : index
    %76 = vector.load %arg4[%c0_18, %c0_19] : memref<1x512xf32, #tpu.memory_space<vmem>>, vector<1x512xf32>
    tpu.vector_store %arg4[%c0_18, %c0_19], %75 {strides = array<i32>} : memref<1x512xf32, #tpu.memory_space<vmem>>, vector<1x512xf32>,
    return
  }
  func.func @transform_0(%arg0: i32, %arg1: memref<1xi32, #tpu.memory_space<smem>>) -> (i32, i32) {
    %c0_i32 = arith.constant 0 : i32
    %c0_i32_0 = arith.constant 0 : i32
    return %arg0, %c0_i32 : i32, i32
  }
  func.func @transform_1(%arg0: i32, %arg1: memref<1xi32, #tpu.memory_space<smem>>) -> (i32, i32) {
    %c0_i32 = arith.constant 0 : i32
    %c0_i32_0 = arith.constant 0 : i32
    return %arg0, %c0_i32 : i32, i32
  }
  func.func @transform_2(%arg0: i32, %arg1: memref<1xi32, #tpu.memory_space<smem>>) -> (i32, i32) {
    %c0_i32 = arith.constant 0 : i32
    %c0_i32_0 = arith.constant 0 : i32
    return %arg0, %c0_i32 : i32, i32
  }
}

</mosaic_0001>

<bundles_post_ra>
// kernel: tpu_custom_call.1
= control target key start
LH: loop header
LB: loop body
LE: loop exit
PB: predicated region body
PF: predicated region fallthrough
CT: control target
= control target key end

     0   :  { %9 = vsyncpa [#allocation5], 0  ;;  %s903_s0 = inlined_call_operand.<no memory space> [shape: s32[1], index: 0, kind: input, shape index: {}]   ;;  %s904_s1 = inlined_call_operand.hbm [shape: f32[1,512], index: 1, kind: input, shape index: {}]   ;;  %s905_s2 = inlined_call_operand.vmem [shape: s8[1,512], index: 2, kind: input, shape index: {}]   ;;  %s906_s3 = inlined_call_operand.hbm [shape: f32[1,512], index: 3, kind: output, shape index: {}]  }
   0x1   :  { %10 = vsyncpa [#allocation6], 0  ;;  %s723_s12 = smov [#allocation4]   ;;  %s675_s16 = scalar_lea.hbm %s904_s1, 64 }
   0x2   :  { %s17_s13 = sshll.u32 %s723_s12, 4  ;;  %p676_p0 = scmp.ne.s32.totalorder %s904_s1, %s675_s16  ;;  %s18_s13 = int_to_ptr.vmem [resolvable:$true] %s17_s13 }
   0x3   :  { %p679_p1 = scmp.lt.u32.totalorder %s675_s16, %s904_s1 }
   0x5   :  { %p681_p2 = pnand %p679_p1, %p676_p0 }
   0x7   :  { %684 = shalt.err (!%p681_p2)
}
   0x8   :  { %s685_s21 = scalar_lea.vmem %s18_s13, 64  ;;  %p690_p4 = scmp.lt.s32.totalorder %s18_s13, %s18_s13 }
   0x9   :  { %p686_p3 = scmp.ne.s32.totalorder %s18_s13, %s685_s21  ;;  %p691_p5 = scmp.lt.s32.totalorder %s685_s21, %s685_s21 }
   0xb   :  { %p692_p6 = por %p691_p5, %p690_p4 }
   0xd   :  { %p693_p7 = pnand %p692_p6, %p686_p3 }
   0xf   :  { %696 = shalt.err (!%p693_p7)
}
  0x10   :  { %20 = dma.hbm_to_vmem [thread:$0]  %s904_s1, 64, %s18_s13, [#allocation5]  }
  0x11   :  { %719 = dma.done.wait [#allocation5], 64  }
  0x12   :  { %720 = vsyncadd [#allocation5], 4294967232  ;;  %v29_v0 = vlaneseq  ;;  %s41_s26 = smul.u32 2246822519, %s903_s0 }
  0x14   :  { %v766_v1 = vshrl.u32 %v29_v0, 7  ;;  %v32_v2 = vand.u32 127, %v29_v0  ;;  %v42_v7 = vstv %s41_s26 }
  0x16   :  { %v33_v3 = vadd.s32 128, %v32_v2  ;;  %v36_v4 = vmul.u32 256, %v766_v1 }
  0x18   :  { %v37_v5 = vadd.s32 %v36_v4, %v32_v2  ;;  %v38_v6 = vadd.s32 %v36_v4, %v33_v3 }
  0x1a   :  { %v39_v8 = vmul.u32 2654435761, %v37_v5  ;;  %v40_v9 = vmul.u32 2654435761, %v38_v6  ;;  %v724_v5 = vmov 683565275  }
  0x1c   :  { %v43_v10 = vadd.s32 %v42_v7, %v39_v8  ;;  %v44_v11 = vadd.s32 %v42_v7, %v40_v9  ;;  %v725_v7 = vmov 2475754826  }
  0x1e   :  { %v61_v12 = vxor.u32 2654435769, %v43_v10  ;;  %v62_v13 = vxor.u32 2654435769, %v44_v11  ;;  %v45_v24 = vshrl.u32 %v43_v10, 16  ;;  %v46_v34 = vshrl.u32 %v44_v11, 16 }
  0x20   :  { %v63_v14 = vshrl.u32 %v61_v12, 16  ;;  %v64_v15 = vshrl.u32 %v62_v13, 16  ;;  %v47_v29 = vxor.u32 %v45_v24, %v43_v10  ;;  %v48_v40 = vxor.u32 %v46_v34, %v44_v11 }
  0x22   :  { %v65_v16 = vxor.u32 %v63_v14, %v61_v12  ;;  %v66_v17 = vxor.u32 %v64_v15, %v62_v13  ;;  %v49_v35 = vmul.u32 2146121005, %v47_v29  ;;  %v50_v45 = vmul.u32 2146121005, %v48_v40 }
  0x23   :  { %v726_v15 = vmov 2131351028  }
  0x24   :  { %v67_v18 = vmul.u32 2146121005, %v65_v16  ;;  %v68_v19 = vmul.u32 2146121005, %v66_v17  ;;  %v51_v41 = vshrl.u32 %v49_v35, 15  ;;  %v52_v52 = vshrl.u32 %v50_v45, 15 }
  0x26   :  { %v69_v20 = vshrl.u32 %v67_v18, 15  ;;  %v70_v21 = vshrl.u32 %v68_v19, 15  ;;  %v53_v47 = vxor.u32 %v51_v41, %v49_v35  ;;  %v54_v58 = vxor.u32 %v52_v52, %v50_v45 }
  0x28   :  { %v71_v22 = vxor.u32 %v69_v20, %v67_v18  ;;  %v72_v23 = vxor.u32 %v70_v21, %v68_v19  ;;  %v55_v54 = vmul.u32 2221713035, %v53_v47  ;;  %v56_v3 = vmul.u32 2221713035, %v54_v58 }
  0x29   :  { %v727_v18 = vmov 2102212464   ;;  %v728_v21 = vmov 920167782  }
  0x2a   :  { %v73_v25 = vmul.u32 2221713035, %v71_v22  ;;  %v74_v26 = vmul.u32 2221713035, %v72_v23  ;;  %v57_v60 = vshrl.u32 %v55_v54, 16 }
  0x2c   :  { %v75_v27 = vshrl.u32 %v73_v25, 16  ;;  %v76_v28 = vshrl.u32 %v74_v26, 16  ;;  %v59_v9 = vxor.u32 %v57_v60, %v55_v54 }
  0x2e   :  { %v77_v30 = vxor.u32 %v75_v27, %v73_v25  ;;  %v78_v31 = vxor.u32 %v76_v28, %v74_v26  ;;  %v729_v26 = vmov 1326507024   ;;  %v79_v41 = vshrl.u32 %v59_v9, 9 }
  0x30   :  { %v87_v32 = vshrl.u32 %v77_v30, 9  ;;  %v88_v33 = vshrl.u32 %v78_v31, 9 }
  0x32   :  { %v89_v36 = vcvt.s32.f32 %v87_v32  ;;  %v90_v37 = vcvt.s32.f32 %v88_v33 }
  0x34   :  { %v91_v38 = vmul.f32 1.1920929e-07, %v89_v36  ;;  %v92_v39 = vmul.f32 1.1920929e-07, %v90_v37  ;;  %v58_v37 = vshrl.u32 %v56_v3, 16 }
  0x36   :  { %v773_v42 = vmul.f32 6.2831855, %v91_v38  ;;  %v775_v43 = vmul.f32 6.2831855, %v92_v39 }
  0x38   :  { %v118_v44 = vand.u32 2139095040, %v773_v42  ;;  %v221_v46 = vand.u32 2139095040, %v775_v43  ;;  %v115_v48 = vand.u32 2147483647, %v773_v42  ;;  %v218_v11 = vand.u32 2147483647, %v775_v43 }
  0x39   :  { %vm117_vm13 = vcmp.lt.s32.totalorder %v773_v42, 0 }
  0x3a   :  { %v119_v49 = vshrl.u32 %v118_v44, 23  ;;  %v222_v50 = vshrl.u32 %v221_v46, 23  ;;  %v122_v55 = vand.u32 8388607, %v115_v48  ;;  %v225_v46 = vand.u32 8388607, %v218_v11 }
  0x3b   :  { %vm835_vm14 = vcmp.le.f32.partialorder %v115_v48, 0.7853982 }
  0x3c   :  { %v625_v51 = vadd.s32 4294967169, %v119_v49  ;;  %v629_v53 = vadd.s32 4294967169, %v222_v50  ;;  %v123_v61 = vor.u32 8388608, %v122_v55 }
  0x3e   :  { %v125_v56 = vadd.s32 1, %v625_v51  ;;  %v228_v57 = vadd.s32 1, %v629_v53  ;;  %v782_v10 = vshll.u32 %v123_v61, 8  ;;  %v226_v61 = vor.u32 8388608, %v225_v46 }
  0x40   :  { %vm126_vm0 = vcmp.gt.s32.totalorder %v125_v56, 0  ;;  %vm229_vm1 = vcmp.gt.s32.totalorder %v228_v57, 0 }
  0x41   :  { %v127_v59 = vsel %vm126_vm0, %v125_v56, 0  ;;  %v230_v63 = vsel %vm229_vm1, %v228_v57, 0  ;;  %v60_v56 = vxor.u32 %v58_v37, %v56_v3  ;;  %vm220_vm1 = vcmp.lt.s32.totalorder %v775_v43, 0 }
  0x42   :  { %v129_v62 = vand.u32 31, %v127_v59  ;;  %v128_v4 = vshrl.u32 %v127_v59, 5  ;;  %v785_v12 = vand.u32 31, %v230_v63 }
  0x44   :  { %v130_v2 = vsub.s32 32, %v129_v62  ;;  %v132_v6 = vshll.u32 %v724_v5, %v129_v62  ;;  %v135_v8 = vshll.u32 %v725_v7, %v129_v62  ;;  %v138_v17 = vshll.u32 %v726_v15, %v129_v62 }
  0x45   :  { %v141_v20 = vshll.u32 %v727_v18, %v129_v62  ;;  %v144_v23 = vshll.u32 %v728_v21, %v129_v62  ;;  %vm147_vm2 = vcmp.lt.s32.totalorder %v128_v4, 1  ;;  %vm148_vm3 = vcmp.lt.s32.totalorder %v128_v4, 2 }
  0x46   :  { %v131_v13 = vshrl.u32 %v724_v5, %v130_v2  ;;  %v133_v14 = vshrl.u32 %v725_v7, %v130_v2  ;;  %v136_v16 = vshrl.u32 %v726_v15, %v130_v2  ;;  %v139_v19 = vshrl.u32 %v727_v18, %v130_v2 }
  0x47   :  { %v142_v22 = vshrl.u32 %v728_v21, %v130_v2  ;;  %v145_v27 = vshrl.u32 %v729_v26, %v130_v2  ;;  %vm149_vm4 = vcmp.lt.s32.totalorder %v128_v4, 3  ;;  %vm150_vm5 = vcmp.lt.s32.totalorder %v128_v4, 4 }
  0x48   :  { %v134_v24 = vor.u32 %v133_v14, %v132_v6  ;;  %v137_v25 = vor.u32 %v136_v16, %v135_v8  ;;  %v140_v28 = vor.u32 %v139_v19, %v138_v17  ;;  %v233_v36 = vsub.s32 32, %v785_v12 }
  0x49   :  { %v143_v29 = vor.u32 %v142_v22, %v141_v20  ;;  %v146_v30 = vor.u32 %v145_v27, %v144_v23  ;;  %v235_v54 = vshll.u32 %v724_v5, %v785_v12  ;;  %v238_v57 = vshll.u32 %v725_v7, %v785_v12 }
  0x4a   :  { %v151_v31 = vsel %vm147_vm2, %v131_v13, %v134_v24  ;;  %v155_v32 = vsel %vm147_vm2, %v134_v24, %v137_v25  ;;  %v152_v33 = vsel %vm150_vm5, %v140_v28, 2102212464  ;;  %v159_v35 = vsel %vm147_vm2, %v137_v25, %v140_v28 }
  0x4b   :  { %v156_v34 = vsel %vm150_vm5, %v143_v29, 920167782  ;;  %v153_v38 = vsel %vm149_vm4, %v137_v25, %v152_v33  ;;  %v160_v40 = vsel %vm150_vm5, %v146_v30, 1326507024  ;;  %v236_v55 = vshrl.u32 %v725_v7, %v233_v36 }
  0x4c   :  { %v157_v39 = vsel %vm149_vm4, %v140_v28, %v156_v34  ;;  %v161_v45 = vsel %vm149_vm4, %v143_v29, %v160_v40  ;;  %v154_v47 = vsel %vm148_vm3, %v151_v31, %v153_v38  ;;  %v239_v58 = vshrl.u32 %v726_v15, %v233_v36 }
  0x4d   :  { %v158_v44 = vsel %vm148_vm3, %v155_v32, %v157_v39  ;;  %v162_v49 = vsel %vm148_vm3, %v159_v35, %v161_v45  ;;  %v241_v59 = vshll.u32 %v726_v15, %v785_v12  ;;  %v170_v60 = vmul.u32 %v782_v10, %v154_v47 }
  0x4e   :  { %v794_v50 = vmul.u32.u64.low %v782_v10, %v158_v44  ;;  %v795_v51 = vmul.u32.u64.high %v782_v10, %v158_v44, %v794_v50  ;;  %v799_v52 = vmul.u32.u64.low %v782_v10, %v162_v49  ;;  %v800_v53 = vmul.u32.u64.high %v782_v10, %v162_v49, %v799_v52 }
  0x4f   :  { %v231_v62 = vshrl.u32 %v230_v63, 5  ;;  %v242_v2 = vshrl.u32 %v727_v18, %v233_v36  ;;  %v81_v4 = vcvt.s32.f32 %v79_v41  ;;  %v234_v8 = vshrl.u32 %v724_v5, %v233_v36 }
  0x50   :  { %v173_v6 = vadd.s32 1, %v795_v51  ;;  %v244_v9 = vshll.u32 %v727_v18, %v785_v12  ;;  %vm172_vm6 = vc.u32 %v800_v53, %v794_v50  ;;  %v237_v3 = vor.u32 %v236_v55, %v235_v54 }
  0x51   :  { %v240_v13 = vor.u32 %v239_v58, %v238_v57  ;;  %v243_v7 = vor.u32 %v242_v2, %v241_v59  ;;  %v245_v15 = vshrl.u32 %v728_v21, %v233_v36  ;;  %v247_v10 = vshll.u32 %v728_v21, %v785_v12 }
  0x52   :  { %v174_v14 = vsel %vm172_vm6, %v173_v6, %v795_v51  ;;  %v248_v16 = vshrl.u32 %v729_v26, %v233_v36  ;;  %vm250_vm7 = vcmp.lt.s32.totalorder %v231_v62, 1  ;;  %vm251_vm8 = vcmp.lt.s32.totalorder %v231_v62, 2 }
  0x53   :  { %v175_v63 = vadd.s32 %v174_v14, %v170_v60  ;;  %v266_v17 = vshll.u32 %v226_v61, 8  ;;  %v246_v19 = vor.u32 %v245_v15, %v244_v9  ;;  %vm252_vm9 = vcmp.lt.s32.totalorder %v231_v62, 3 }
  0x54   :  { %v249_v5 = vor.u32 %v248_v16, %v247_v10  ;;  %vm253_vm10 = vcmp.lt.s32.totalorder %v231_v62, 4  ;;  %v258_v22 = vsel %vm250_vm7, %v237_v3, %v240_v13  ;;  %v262_v23 = vsel %vm250_vm7, %v240_v13, %v243_v7 }
  0x55   :  { %v176_v18 = vadd.s32 536870912, %v175_v63  ;;  %v255_v20 = vsel %vm253_vm10, %v243_v7, 2102212464  ;;  %v254_v24 = vsel %vm250_vm7, %v234_v8, %v237_v3  ;;  %v259_v25 = vsel %vm253_vm10, %v246_v19, 920167782 }
  0x56   :  { %v263_v27 = vsel %vm253_vm10, %v249_v5, 1326507024  ;;  %v256_v29 = vsel %vm252_vm9, %v240_v13, %v255_v20  ;;  %v260_v12 = vsel %vm252_vm9, %v243_v7, %v259_v25  ;;  %v80_v26 = vshrl.u32 %v60_v56, 9 }
  0x57   :  { %v812_v28 = vshrl.u32 %v176_v18, 30  ;;  %v264_v21 = vsel %vm252_vm9, %v246_v19, %v263_v27  ;;  %v261_v30 = vsel %vm251_vm8, %v258_v22, %v260_v12  ;;  %v83_v32 = vadd.f32 1.0, %v81_v4 }
  0x58   :  { %v265_v31 = vsel %vm251_vm8, %v262_v23, %v264_v21  ;;  %v257_v36 = vsel %vm251_vm8, %v254_v24, %v256_v29  ;;  %v821_v37 = vmul.u32.u64.low %v266_v17, %v261_v30  ;;  %v822_v38 = vmul.u32.u64.high %v266_v17, %v261_v30, %v821_v37 }
  0x59   :  { %v178_v33 = vshll.u32 %v812_v28, 30  ;;  %v817_v34 = vmul.u32.u64.low %v266_v17, %v265_v31  ;;  %v818_v35 = vmul.u32.u64.high %v266_v17, %v265_v31, %v817_v34  ;;  %v82_v40 = vcvt.s32.f32 %v80_v26 }
  0x5a   :  { %v85_v41 = vmul.f32 1.1920929e-07, %v83_v32  ;;  %v273_v45 = vmul.u32 %v266_v17, %v257_v36  ;;  %v276_v46 = vadd.s32 1, %v822_v38  ;;  %v171_v58 = vadd.s32 %v794_v50, %v800_v53  ;;  %v541_v36 = vld [vmem:[%s905_s2] sm:$0xf]  ;;  %s732_s2 = smov [#allocation7]  }
  0x5b   :  { %v179_v39 = vsub.s32 %v175_v63, %v178_v33  ;;  %vm275_vm11 = vc.u32 %v818_v35, %v821_v37  ;;  %v84_v51 = vadd.f32 1.0, %v82_v40  ;;  %v201_v18 = vsub.s32 4, %v812_v28  ;;  %s616_s27 = sshll.u32 %s732_s2, 4  ;;  %s617_s27 = int_to_ptr.vmem [resolvable:$true] %s616_s27 }
  0x5c   :  { %v277_v49 = vsel %vm275_vm11, %v276_v46, %v822_v38  ;;  %659 = vlog2.f32 %v85_v41  ;;  %v274_v24 = vadd.s32 %v821_v37, %v818_v35  ;;  %vm542_vm0 = vnez %v541_v36  ;;  %s697_s28 = scalar_lea.vmem %s617_s27, 64  ;;  %p702_p9 = scmp.lt.s32.totalorder %s617_s27, %s617_s27 }
  0x5d   :  { %v181_v44 = vsub.s32 0, %v179_v39  ;;  %v278_v54 = vadd.s32 %v277_v49, %v273_v45  ;;  %v86_v57 = vmul.f32 1.1920929e-07, %v84_v51  ;;  %v202_v30 = vsel %vm117_vm13, %v201_v18, %v812_v28  ;;  %p698_p8 = scmp.ne.s32.totalorder %s617_s27, %s697_s28  ;;  %p703_p10 = scmp.lt.s32.totalorder %s697_s28, %s697_s28 }
  0x5e   :  { %v204_v33 = vsel %vm835_vm14, 0, %v202_v30  ;;  %v730_v46 = vmov 0   ;;  %vm219_vm2 = vcmp.le.f32.partialorder %v218_v11, 0.7853982  ;;  %vm207_vm11 = vweird.f32 %v773_v42 }
  0x5f   :  { %v626_v47 = vmin.u32 %v181_v44, %v179_v39  ;;  %v279_v56 = vadd.s32 536870912, %v278_v54  ;;  %661 = vlog2.f32 %v86_v57  ;;  %v416_v40 = vadd.s32 3, %v204_v33  ;;  %p704_p11 = por %p703_p10, %p702_p9 }
  0x60   :  { %v208_v44 = vand.u32 3, %v204_v33  ;;  %v556_v22 = vsub.s32 4, %v766_v1 }
  0x61   :  { %v183_v52 = vclz %v626_v47  ;;  %v280_v59 = vshrl.u32 %v279_v56, 30  ;;  %v543_v47 = vsel %vm542_vm0, 16843009, %v730_v46  ;;  %p705_p12 = pnand %p704_p11, %p698_p8 }
  0x62   :  { %vm210_vm3 = vcmp.eq.s32.totalorder %v208_v44, 0  ;;  %v544_v57 = vunpack.c.0.s8 %v543_v47  ;;  %vm213_vm4 = vcmp.eq.s32.totalorder %v208_v44, 2  ;;  %vm209_vm8 = vcmp.lt.s32.totalorder %v208_v44, 2 }
  0x63   :  { %v627_v55 = vadd.s32 4294967294, %v183_v52  ;;  %v281_v4 = vshll.u32 %v280_v59, 30  ;;  %v417_v52 = vand.u32 3, %v416_v40 }
  0x64   :  { %vm546_vm10 = vcmp.ne.s32.totalorder %v544_v57, 0 }
  0x65   :  { %vm628_vm12 = vcmp.lt.s32.totalorder %v627_v55, 0  ;;  %v282_v9 = vsub.s32 %v278_v54, %v281_v4  ;;  %vm419_vm5 = vcmp.eq.s32.totalorder %v417_v52, 0  ;;  %vm422_vm6 = vcmp.eq.s32.totalorder %v417_v52, 2 }
  0x66   :  { %v186_v60 = vsel %vm628_vm12, 0, %v627_v55  ;;  %v660_v3 = vpop.eup %659  ;;  %v545_v4 = vunpack.c.1.s8 %v543_v47  ;;  %vm418_vm9 = vcmp.lt.s32.totalorder %v417_v52, 2 }
  0x67   :  { %v187_v61 = vsub.s32 32, %v186_v60  ;;  %v188_v62 = vshll.u32 %v179_v39, %v186_v60  ;;  %v191_v2 = vsub.s32 4294967266, %v186_v60  ;;  %v284_v14 = vsub.s32 0, %v282_v9 }
  0x68   :  { %v94_v63 = vmul.f32 0.6931472, %v660_v3  ;;  %v304_v39 = vsub.s32 4, %v280_v59  ;;  %vm863_vm12 = vcmp.ne.s32.totalorder %v545_v4, 0  ;;  %v574_v4 = vld [vmem:[#allocation4] sm:$0xf] }
  0x69   :  { %v189_v6 = vshrl.u32 %v171_v58, %v187_v61  ;;  %v192_v8 = vadd.s32 127, %v191_v2  ;;  %v630_v16 = vmin.u32 %v284_v14, %v282_v9  ;;  %v662_v20 = vpop.eup %661 }
  0x6a   :  { %v829_v5 = vmul.f32 -2.0, %v94_v63  ;;  %v96_v26 = vmul.f32 0.6931472, %v662_v20  ;;  %v305_v51 = vsel %vm220_vm1, %v304_v39, %v280_v59  ;;  %v548_v20 = vsel %vm546_vm10, 1, %v730_v46 }
  0x6b   :  { %v190_v13 = vor.u32 %v189_v6, %v188_v62  ;;  %v193_v7 = vshll.u32 %v192_v8, 23  ;;  %v286_v53 = vclz %v630_v16  ;;  %v307_v62 = vsel %vm219_vm2, 0, %v305_v51 }
  0x6c   :  { %663 = vrsqrt.f32 %v829_v5  ;;  %v850_v37 = vmul.f32 -2.0, %v96_v26  ;;  %vm101_vm7 = vcmp.eq.f32.partialorder %v829_v5, inf  ;;  %v520_v11 = vadd.s32 3, %v307_v62 }
  0x6d   :  { %v194_v15 = vor.u32 4788187, %v193_v7  ;;  %v197_v10 = vcvt.s32.f32 %v190_v13  ;;  %v631_v19 = vadd.s32 4294967294, %v286_v53  ;;  %v552_v7 = vsub.s32 0, %v766_v1 }
  0x6e   :  { %v104_v14 = vand.u32 2147483648, %v829_v5  ;;  %v521_v18 = vand.u32 3, %v520_v11  ;;  %v557_v36 = vrot.slane %v548_v20, %v556_v22 }
  0x6f   :  { %v195_v50 = vand.u32 2147483647, %v194_v15  ;;  %vm632_vm15 = vcmp.lt.s32.totalorder %v631_v19, 0 }
  0x70   :  { %v289_v25 = vsel %vm632_vm15, 0, %v631_v19  ;;  %v311_v19 = vand.u32 3, %v307_v62  ;;  %vm110_vm15 = vcmp.eq.f32.partialorder %v850_v37, 0.0 }
  0x71   :  { %v198_v17 = vmul.f32 %v197_v10, %v195_v50  ;;  %v290_v29 = vsub.s32 32, %v289_v25  ;;  %v291_v12 = vshll.u32 %v282_v9, %v289_v25  ;;  %v294_v21 = vsub.s32 4294967266, %v289_v25 }
  0x72   :  { %v731_v10 = vmov 1966171168   ;;  %vm313_vm0 = vcmp.eq.s32.totalorder %v311_v19, 0 }
  0x73   :  { %v199_v23 = vxor.u32 2147483648, %v198_v17  ;;  %v292_v31 = vshrl.u32 %v274_v24, %v290_v29  ;;  %v295_v32 = vadd.s32 127, %v294_v21  ;;  %v582_v16 = vunpack.c.l.s4 %v731_v10 }
  0x74   :  { %v549_v29 = vsel %vm863_vm12, 1, %v730_v46 }
  0x75   :  { %v200_v27 = vsel %vm117_vm13, %v199_v23, %v198_v17  ;;  %v293_v34 = vor.u32 %v292_v31, %v291_v12  ;;  %v296_v35 = vshll.u32 %v295_v32, 23  ;;  %vm103_vm13 = vcmp.eq.f32.partialorder %v829_v5, 0.0 }
  0x76   :  { %v203_v48 = vsel %vm835_vm14, %v773_v42, %v200_v27  ;;  %v664_v49 = vpop.eup %663  ;;  %vm108_vm14 = vcmp.eq.f32.partialorder %v850_v37, inf  ;;  %v583_v25 = vunpack.c.0.s8 %v582_v16  ;;  %v111_v27 = vand.u32 2147483648, %v850_v37 }
  0x77   :  { %665 = vcosq.f32 %v203_v48  ;;  %v297_v28 = vor.u32 4788187, %v296_v35  ;;  %v300_v38 = vcvt.s32.f32 %v293_v34  ;;  %v100_v59 = vmul.f32 %v664_v49, %v829_v5 }
  0x78   :  { %667 = vsinq.f32 %v203_v48  ;;  %v553_v12 = vrot.slane %v548_v20, %v552_v7  ;;  %v561_v33 = vrot.slane %v549_v29, %v552_v7  ;;  %v565_v40 = vrot.slane %v549_v29, %v556_v22 }
  0x79   :  { %v298_v41 = vand.u32 2147483647, %v297_v28  ;;  %669 = vrsqrt.f32 %v850_v37  ;;  %v102_v63 = vsel %vm101_vm7, %v829_v5, %v100_v59 }
  0x7a   :  { %v105_v23 = vsel %vm103_vm13, %v104_v14, %v102_v63  ;;  %vm566_vm7 = vcmp.ne.s32.totalorder %v553_v12, 0  ;;  %vm569_vm10 = vcmp.ne.s32.totalorder %v565_v40, 0 }
  0x7b   :  { %v301_v45 = vmul.f32 %v300_v38, %v298_v41 }
  0x7d   :  { %v302_v55 = vxor.u32 2147483648, %v301_v45 }
  0x7f   :  { %v303_v61 = vsel %vm220_vm1, %v302_v55, %v301_v45  ;;  %vm316_vm1 = vcmp.eq.s32.totalorder %v311_v19, 2 }
  0x80   :  { %v306_v2 = vsel %vm219_vm2, %v775_v43, %v303_v61  ;;  %vm526_vm2 = vcmp.eq.s32.totalorder %v521_v18, 2 }
  0x81   :  { %v666_v54 = vpop.eup %665  ;;  %671 = vcosq.f32 %v306_v2 }
  0x82   :  { %v668_v56 = vpop.eup %667  ;;  %v214_v60 = vxor.u32 2147483648, %v666_v54  ;;  %673 = vsinq.f32 %v306_v2 }
  0x83   :  { %v211_v58 = vxor.u32 2147483648, %v668_v56  ;;  %v670_v13 = vpop.eup %669 }
  0x84   :  { %v215_v8 = vsel %vm213_vm4, %v214_v60, %v668_v56  ;;  %v424_v3 = vsel %vm422_vm6, %v214_v60, %v668_v56  ;;  %v107_v17 = vmul.f32 %v670_v13, %v850_v37  ;;  %vm312_vm4 = vcmp.lt.s32.totalorder %v311_v19, 2 }
  0x85   :  { %v212_v6 = vsel %vm210_vm3, %v666_v54, %v211_v58  ;;  %v421_v9 = vsel %vm419_vm5, %v666_v54, %v211_v58  ;;  %vm523_vm3 = vcmp.eq.s32.totalorder %v521_v18, 0  ;;  %vm522_vm5 = vcmp.lt.s32.totalorder %v521_v18, 2 }
  0x86   :  { %v216_v50 = vsel %vm209_vm8, %v212_v6, %v215_v8  ;;  %v425_v53 = vsel %vm418_vm9, %v421_v9, %v424_v3  ;;  %v109_v26 = vsel %vm108_vm14, %v850_v37, %v107_v17  ;;  %vm310_vm6 = vweird.f32 %v775_v43 }
  0x87   :  { %v217_v24 = vsel %vm207_vm11, nan, %v216_v50  ;;  %v426_v5 = vsel %vm207_vm11, nan, %v425_v53  ;;  %v112_v28 = vsel %vm110_vm15, %v111_v27, %v109_v26  ;;  %vm568_vm8 = vcmp.ne.s32.totalorder %v561_v33, 0 }
  0x88   :  { %v321_v31 = vmul.f32 %v217_v24, %v105_v23  ;;  %v531_v42 = vmul.f32 %v426_v5, %v105_v23  ;;  %vm567_vm9 = vcmp.ne.s32.totalorder %v557_v36, 0  ;;  %v586_v56 = vsub.s32 %v583_v25, %v766_v1 }
  0x89   :  { %vm607_vm11 = vcmp.lt.s32.totalorder %v29_v0, 512 }
  0x8a   :  { %v533_v45 = vmul.f32 0.01, %v321_v31  ;;  %v535_v46 = vmul.f32 0.01, %v531_v42 }
  0x8b   :  { %v672_v21 = vpop.eup %671 }
  0x8c   :  { %v674_v30 = vpop.eup %673  ;;  %v317_v48 = vxor.u32 2147483648, %v672_v21  ;;  %v570_v37 = vsel %vm566_vm7, %v533_v45, 0.0  ;;  %v572_v55 = vsel %vm568_vm8, %v535_v46, 0.0 }
  0x8d   :  { %v314_v32 = vxor.u32 2147483648, %v674_v30 }
  0x8e   :  { %v318_v34 = vsel %vm316_vm1, %v317_v48, %v674_v30  ;;  %v528_v35 = vsel %vm526_vm2, %v317_v48, %v674_v30 }
  0x8f   :  { %v315_v38 = vsel %vm313_vm0, %v672_v21, %v314_v32  ;;  %v525_v39 = vsel %vm523_vm3, %v672_v21, %v314_v32 }
  0x90   :  { %v319_v41 = vsel %vm312_vm4, %v315_v38, %v318_v34  ;;  %v529_v44 = vsel %vm522_vm5, %v525_v39, %v528_v35 }
  0x91   :  { %v320_v47 = vsel %vm310_vm6, nan, %v319_v41  ;;  %v530_v49 = vsel %vm310_vm6, nan, %v529_v44 }
  0x92   :  { %v322_v51 = vmul.f32 %v320_v47, %v112_v28  ;;  %v532_v43 = vmul.f32 %v530_v49, %v112_v28 }
  0x94   :  { %v534_v52 = vmul.f32 0.01, %v322_v51  ;;  %v536_v54 = vmul.f32 0.01, %v532_v43 }
  0x96   :  { %v571_v57 = vsel %vm567_vm9, %v534_v52, 0.0  ;;  %v573_v58 = vsel %vm569_vm10, %v536_v54, 0.0 }
  0x97   :  { %v579_v60 = vcombine.low %v570_v37, %v571_v57  ;;  %v580_v61 = vcombine.low %v572_v55, %v573_v58 }
  0x99   :  { %v587_v62 = vrot.slane %v579_v60, %v586_v56  ;;  %v594_v2 = vrot.slane %v580_v61, %v586_v56 }
  0x9b   :  { %v595_v59 = vcombine.low %v587_v62, %v594_v2 }
  0x9d   :  { %v602_v11 = vrot.slane %v595_v59, %v586_v56 }
  0x9f   :  { %v604_v6 = vadd.f32 %v602_v11, %v574_v4 }
  0xa1   :  { %609 = vst.msk [vmem:[#allocation7] sm:$0xf] %vm607_vm11, %v604_v6 }
  0xa2   :  { %708 = shalt.err (!%p705_p12)
}
  0xa3   :  { %s709_s4 = scalar_lea.hbm %s906_s3, 64 }
  0xa4   :  { %p710_p13 = scmp.ne.s32.totalorder %s906_s3, %s709_s4  ;;  %p713_p0 = scmp.lt.u32.totalorder %s709_s4, %s906_s3 }
  0xa6   :  { %p715_p1 = pnand %p713_p0, %p710_p13 }
  0xa8   :  { %718 = shalt.err (!%p715_p1)
}
  0xa9   :  { %619 = dma.vmem_to_hbm [thread:$0]  %s617_s27, 64, %s906_s3, [#allocation6]  }
  0xaa   :  { %721 = dma.done.wait [#allocation6], 64  }
  0xab   :  { %722 = vsyncadd [#allocation6], 4294967232 }
  0xac   :  { %623 = vsyncpa [#allocation5], 1 }
  0xad   :  { %624 = vsyncpa [#allocation6], 1 }

</bundles_post_ra>
